<compile_context>
chip_gen: v7x
topology: tpu7x:2x2x1
jax: 0.10.0
libtpu: 0.0.40
codegen_flags: <defaults>
</compile_context>

<pallas_src>
import functools

import jax
import jax.numpy as jnp
from jax import lax
from jax.experimental import pallas as pl
from jax.experimental.pallas import tpu as pltpu


def _neg_pearson_kernel(preds_ref, labels_ref, out_ref, acc_ref, *,
                        n_total, tile_t, mask_tail):
    """One (TILE_B, TILE_T) tile per step; accumulate row partial sums.

    preds_ref / labels_ref : VMEM (TILE_B, TILE_T) input tiles
    out_ref                : VMEM (TILE_B, 1) per-sample loss (written at last t)
    acc_ref                : VMEM (TILE_B, 8) packed partial sums
                             lanes 0..4 = sum_x, sum_y, sum_xy, sum_x2, sum_y2
    """
    t = pl.program_id(1)

    @pl.when(t == 0)
    def _init():
        acc_ref[...] = jnp.zeros_like(acc_ref)

    x = preds_ref[...].astype(jnp.float32)
    y = labels_ref[...].astype(jnp.float32)

    if mask_tail:
        # Last time-tile may be padded past T; zero out the padded lanes so
        # they do not pollute the sums.
        col = t * tile_t + lax.broadcasted_iota(jnp.int32, x.shape, 1)
        valid = col < n_total
        x = jnp.where(valid, x, 0.0)
        y = jnp.where(valid, y, 0.0)

    # Single pass over the tile: all five row reductions from the same vregs.
    sx = jnp.sum(x, axis=1, keepdims=True)
    sy = jnp.sum(y, axis=1, keepdims=True)
    sxy = jnp.sum(x * y, axis=1, keepdims=True)
    sx2 = jnp.sum(x * x, axis=1, keepdims=True)
    sy2 = jnp.sum(y * y, axis=1, keepdims=True)

    tb = acc_ref.shape[0]
    lane = lax.broadcasted_iota(jnp.int32, (tb, 8), 1)
    zero = jnp.float32(0.0)
    partial = (jnp.where(lane == 0, sx, zero)
               + jnp.where(lane == 1, sy, zero)
               + jnp.where(lane == 2, sxy, zero)
               + jnp.where(lane == 3, sx2, zero)
               + jnp.where(lane == 4, sy2, zero))
    acc_ref[...] += partial

    @pl.when(t == pl.num_programs(1) - 1)
    def _finalize():
        acc = acc_ref[...]
        sum_x, sum_y = acc[:, 0:1], acc[:, 1:2]
        sum_xy, sum_x2, sum_y2 = acc[:, 2:3], acc[:, 3:4], acc[:, 4:5]

        n = jnp.float32(n_total)
        eps = jnp.float32(1e-8)

        ssx = n * sum_x2 - sum_x * sum_x
        ssy = n * sum_y2 - sum_y * sum_y

        # Gate "unbiased std <= eps" without a second data pass:
        #   sqrt(ss / (N*(N-1))) <= eps  <=>  ss <= eps^2 * N * (N-1)
        gate = (eps * eps) * n * (n - 1.0)
        degenerate = (ssx <= gate) | (ssy <= gate)

        # Clamp before sqrt: f32 cancellation can make ssx/ssy slightly
        # negative for near-constant rows, which would yield NaN.
        denom = jnp.sqrt(jnp.maximum(ssx, 0.0) * jnp.maximum(ssy, 0.0)) + eps
        pearson = (n * sum_xy - sum_x * sum_y) / denom
        sample_loss = jnp.where(degenerate, 0.0, 1.0 - pearson)  # (TILE_B, 1)
        out_ref[...] = sample_loss.astype(out_ref.dtype)


def _choose_tile_t(T: int) -> int:
    # Whole row fits comfortably -> single block (also handles T < 128).
    if T <= 1024:
        return T
    # Prefer a 128-lane-aligned tile that divides T exactly (no tail masking).
    for cand in (1024, 512, 256, 128):
        if T % cand == 0:
            return cand
    # Fall back; tail block is masked in-kernel.
    return 512


def neg_pearson_loss(preds: jax.Array, labels: jax.Array, *,
                     tile_t: int | None = None) -> jax.Array:
    """Pallas TPU implementation of the Neg_Pearson forward pass.

    Args:
      preds:  [B, T] float array (f32 or bf16 — no wrapper up-cast).
      labels: [B, T] float array.
      tile_t: optional time-tile override (mostly for testing).
    Returns:
      scalar float32 loss.
    """
    assert preds.shape == labels.shape and preds.ndim == 2
    B, T = preds.shape

    if tile_t is None:
        tile_t = _choose_tile_t(T)
    tile_t = min(tile_t, T)
    tile_b = min(B, 128)           # full B if small, else 8-aligned 128 blocks

    grid = (pl.cdiv(B, tile_b), pl.cdiv(T, tile_t))
    mask_tail = (T % tile_t) != 0

    kernel = functools.partial(
        _neg_pearson_kernel, n_total=T, tile_t=tile_t, mask_tail=mask_tail)

    per_sample = pl.pallas_call(
        kernel,
        out_shape=jax.ShapeDtypeStruct((B, 1), jnp.float32),
        grid_spec=pltpu.PrefetchScalarGridSpec(
            num_scalar_prefetch=0,
            grid=grid,
            in_specs=[
                pl.BlockSpec((tile_b, tile_t), lambda b, t: (b, t)),
                pl.BlockSpec((tile_b, tile_t), lambda b, t: (b, t)),
            ],
            out_specs=pl.BlockSpec((tile_b, 1), lambda b, t: (b, 0)),
            scratch_shapes=[pltpu.VMEM((tile_b, 8), jnp.float32)],
        ),
        compiler_params=pltpu.CompilerParams(
            dimension_semantics=("parallel", "arbitrary")),
    )(preds, labels)

    # Tiny (B,) mean done outside the kernel so the batch grid axis can stay
    # "parallel" (v7x dual-TensorCore) without a cross-core scalar reduction.
    return jnp.mean(per_sample)


def _reference_neg_pearson(preds, labels):
    """Pure-JAX reference mirroring the PyTorch loop exactly."""
    eps = 1e-8
    B, T = preds.shape
    N = float(T)
    loss = 0.0
    for i in range(B):
        x = preds[i].astype(jnp.float32)
        y = labels[i].astype(jnp.float32)
        std_x = jnp.std(x, ddof=1)
        std_y = jnp.std(y, ddof=1)
        sum_x = jnp.sum(x)
        sum_y = jnp.sum(y)
        sum_xy = jnp.sum(x * y)
        sum_x2 = jnp.sum(x * x)
        sum_y2 = jnp.sum(y * y)
        denom = jnp.sqrt((N * sum_x2 - sum_x ** 2) * (N * sum_y2 - sum_y ** 2)) + eps
        pearson = (N * sum_xy - sum_x * sum_y) / denom
        sample = jnp.where((std_x <= eps) | (std_y <= eps), 0.0, 1.0 - pearson)
        loss = loss + sample
    return loss / B


if __name__ == "__main__":
    key = jax.random.PRNGKey(0)
    k1, k2, k3, k4 = jax.random.split(key, 4)

    # Small shapes consistent with (batch, seq) inputs to this loss.
    B, T = 2, 8
    preds = jax.random.normal(k1, (B, T), dtype=jnp.float32)
    labels = jax.random.normal(k2, (B, T), dtype=jnp.float32)

    loss = neg_pearson_loss(preds, labels)
    jax.block_until_ready(loss)
    ref = _reference_neg_pearson(preds, labels)
    assert jnp.allclose(loss, ref, atol=1e-5, rtol=1e-5), (loss, ref)

    # Exercise the multi-step time grid + accumulator, the degenerate-row gate
    # (constant labels row -> sample loss 0), and the masked-tail path.
    B2, T2 = 4, 384
    preds2 = jax.random.normal(k3, (B2, T2), dtype=jnp.float32)
    labels2 = jax.random.normal(k4, (B2, T2), dtype=jnp.float32)
    labels2 = labels2.at[0].set(1.0)  # constant row -> std <= eps -> loss 0
    ref2 = _reference_neg_pearson(preds2, labels2)

    loss2 = neg_pearson_loss(preds2, labels2, tile_t=128)   # 3 exact tiles
    jax.block_until_ready(loss2)
    assert jnp.allclose(loss2, ref2, atol=1e-5, rtol=1e-5), (loss2, ref2)

    loss3 = neg_pearson_loss(preds2, labels2, tile_t=256)   # padded tail tile
    jax.block_until_ready(loss3)
    assert jnp.allclose(loss3, ref2, atol=1e-5, rtol=1e-5), (loss3, ref2)

    print("KERNEL_OK")
</pallas_src>

<mosaic_0001>
module attributes {stable_mosaic.version = 11 : i64} {
  func.func @_neg_pearson_kernel(%arg0: i32, %arg1: i32, %arg2: memref<2x8xf32, #tpu.memory_space<vmem>>, %arg3: memref<2x8xf32, #tpu.memory_space<vmem>>, %arg4: memref<2x1xf32, #tpu.memory_space<vmem>>, %arg5: memref<2x8xf32, #tpu.memory_space<vmem>>) attributes {dimension_semantics = [#tpu.dimension_semantics<parallel>, #tpu.dimension_semantics<arbitrary>], iteration_bounds = array<i64: 1, 1>, scalar_prefetch = 0 : i64, scratch_operands = 1 : i64, tpu.core_type = #tpu.core_type<tc>, window_params = [{transform_indices = @transform_0, window_bounds = array<i64: 2, 8>}, {transform_indices = @transform_1, window_bounds = array<i64: 2, 8>}, {transform_indices = @transform_2, window_bounds = array<i64: 2, 1>}]} {
    %c0_i32 = arith.constant 0 : i32
    %0 = arith.cmpi eq, %arg1, %c0_i32 : i32
    %1 = arith.extui %0 : i1 to i32
    %c0_i32_0 = arith.constant 0 : i32
    %2 = arith.cmpi ne, %1, %c0_i32_0 : i32
    scf.if %2 {
      %cst_20 = arith.constant 0.000000e+00 : f32
      %59 = vector.broadcast %cst_20 : f32 to vector<2x8xf32>
      %c0_21 = arith.constant 0 : index
      %c0_22 = arith.constant 0 : index
      %60 = vector.load %arg5[%c0_21, %c0_22] : memref<2x8xf32, #tpu.memory_space<vmem>>, vector<2x8xf32>
      tpu.vector_store %arg5[%c0_21, %c0_22], %59 {strides = array<i32>} : memref<2x8xf32, #tpu.memory_space<vmem>>, vector<2x8xf32>,
    } else {
    }
    %c0 = arith.constant 0 : index
    %c0_1 = arith.constant 0 : index
    %3 = vector.load %arg2[%c0, %c0_1] : memref<2x8xf32, #tpu.memory_space<vmem>>, vector<2x8xf32>
    %c0_2 = arith.constant 0 : index
    %c0_3 = arith.constant 0 : index
    %4 = vector.load %arg3[%c0_2, %c0_3] : memref<2x8xf32, #tpu.memory_space<vmem>>, vector<2x8xf32>
    %cst = arith.constant dense<0.000000e+00> : vector<2xf32>
    %5 = vector.multi_reduction <add>, %3, %cst [1] : vector<2x8xf32> to vector<2xf32>
    %6 = vector.shape_cast %5 : vector<2xf32> to vector<2x1xf32>
    %cst_4 = arith.constant dense<0.000000e+00> : vector<2xf32>
    %7 = vector.multi_reduction <add>, %4, %cst_4 [1] : vector<2x8xf32> to vector<2xf32>
    %8 = vector.shape_cast %7 : vector<2xf32> to vector<2x1xf32>
    %9 = arith.mulf %3, %4 : vector<2x8xf32>
    %cst_5 = arith.constant dense<0.000000e+00> : vector<2xf32>
    %10 = vector.multi_reduction <add>, %9, %cst_5 [1] : vector<2x8xf32> to vector<2xf32>
    %11 = vector.shape_cast %10 : vector<2xf32> to vector<2x1xf32>
    %12 = arith.mulf %3, %3 : vector<2x8xf32>
    %cst_6 = arith.constant dense<0.000000e+00> : vector<2xf32>
    %13 = vector.multi_reduction <add>, %12, %cst_6 [1] : vector<2x8xf32> to vector<2xf32>
    %14 = vector.shape_cast %13 : vector<2xf32> to vector<2x1xf32>
    %15 = arith.mulf %4, %4 : vector<2x8xf32>
    %cst_7 = arith.constant dense<0.000000e+00> : vector<2xf32>
    %16 = vector.multi_reduction <add>, %15, %cst_7 [1] : vector<2x8xf32> to vector<2xf32>
    %17 = vector.shape_cast %16 : vector<2xf32> to vector<2x1xf32>
    %18 = tpu.iota {dimensions = array<i32: 1>} : vector<2x8xi32>
    %c0_i32_8 = arith.constant 0 : i32
    %19 = vector.broadcast %c0_i32_8 : i32 to vector<2x8xi32>
    %20 = arith.cmpi eq, %18, %19 : vector<2x8xi32>
    %cst_9 = arith.constant 0.000000e+00 : f32
    %21 = vector.shape_cast %6 : vector<2x1xf32> to vector<2x1xf32>
    %22 = vector.broadcast %21 : vector<2x1xf32> to vector<2x8xf32>
    %23 = vector.broadcast %cst_9 : f32 to vector<2x8xf32>
    %24 = arith.select %20, %22, %23 : vector<2x8xi1>, vector<2x8xf32>
    %c1_i32 = arith.constant 1 : i32
    %25 = vector.broadcast %c1_i32 : i32 to vector<2x8xi32>
    %26 = arith.cmpi eq, %18, %25 : vector<2x8xi32>
    %cst_10 = arith.constant 0.000000e+00 : f32
    %27 = vector.shape_cast %8 : vector<2x1xf32> to vector<2x1xf32>
    %28 = vector.broadcast %27 : vector<2x1xf32> to vector<2x8xf32>
    %29 = vector.broadcast %cst_10 : f32 to vector<2x8xf32>
    %30 = arith.select %26, %28, %29 : vector<2x8xi1>, vector<2x8xf32>
    %31 = arith.addf %24, %30 : vector<2x8xf32>
    %c2_i32 = arith.constant 2 : i32
    %32 = vector.broadcast %c2_i32 : i32 to vector<2x8xi32>
    %33 = arith.cmpi eq, %18, %32 : vector<2x8xi32>
    %cst_11 = arith.constant 0.000000e+00 : f32
    %34 = vector.shape_cast %11 : vector<2x1xf32> to vector<2x1xf32>
    %35 = vector.broadcast %34 : vector<2x1xf32> to vector<2x8xf32>
    %36 = vector.broadcast %cst_11 : f32 to vector<2x8xf32>
    %37 = arith.select %33, %35, %36 : vector<2x8xi1>, vector<2x8xf32>
    %38 = arith.addf %31, %37 : vector<2x8xf32>
    %c3_i32 = arith.constant 3 : i32
    %39 = vector.broadcast %c3_i32 : i32 to vector<2x8xi32>
    %40 = arith.cmpi eq, %18, %39 : vector<2x8xi32>
    %cst_12 = arith.constant 0.000000e+00 : f32
    %41 = vector.shape_cast %14 : vector<2x1xf32> to vector<2x1xf32>
    %42 = vector.broadcast %41 : vector<2x1xf32> to vector<2x8xf32>
    %43 = vector.broadcast %cst_12 : f32 to vector<2x8xf32>
    %44 = arith.select %40, %42, %43 : vector<2x8xi1>, vector<2x8xf32>
    %45 = arith.addf %38, %44 : vector<2x8xf32>
    %c4_i32 = arith.constant 4 : i32
    %46 = vector.broadcast %c4_i32 : i32 to vector<2x8xi32>
    %47 = arith.cmpi eq, %18, %46 : vector<2x8xi32>
    %cst_13 = arith.constant 0.000000e+00 : f32
    %48 = vector.shape_cast %17 : vector<2x1xf32> to vector<2x1xf32>
    %49 = vector.broadcast %48 : vector<2x1xf32> to vector<2x8xf32>
    %50 = vector.broadcast %cst_13 : f32 to vector<2x8xf32>
    %51 = arith.select %47, %49, %50 : vector<2x8xi1>, vector<2x8xf32>
    %52 = arith.addf %45, %51 : vector<2x8xf32>
    %c0_14 = arith.constant 0 : index
    %c0_15 = arith.constant 0 : index
    %53 = vector.load %arg5[%c0_14, %c0_15] : memref<2x8xf32, #tpu.memory_space<vmem>>, vector<2x8xf32>
    %54 = arith.addf %53, %52 : vector<2x8xf32>
    %c0_16 = arith.constant 0 : index
    %c0_17 = arith.constant 0 : index
    %55 = vector.load %arg5[%c0_16, %c0_17] : memref<2x8xf32, #tpu.memory_space<vmem>>, vector<2x8xf32>
    tpu.vector_store %arg5[%c0_16, %c0_17], %54 {strides = array<i32>} : memref<2x8xf32, #tpu.memory_space<vmem>>, vector<2x8xf32>,
    %c0_i32_18 = arith.constant 0 : i32
    %56 = arith.cmpi eq, %arg1, %c0_i32_18 : i32
    %57 = arith.extui %56 : i1 to i32
    %c0_i32_19 = arith.constant 0 : i32
    %58 = arith.cmpi ne, %57, %c0_i32_19 : i32
    scf.if %58 {
      %c0_20 = arith.constant 0 : index
      %c0_21 = arith.constant 0 : index
      %59 = vector.load %arg5[%c0_20, %c0_21] : memref<2x8xf32, #tpu.memory_space<vmem>>, vector<2x8xf32>
      %60 = vector.extract_strided_slice %59 {offsets = [0, 0], sizes = [2, 1], strides = [1, 1]} : vector<2x8xf32> to vector<2x1xf32>
      %61 = vector.extract_strided_slice %59 {offsets = [0, 1], sizes = [2, 1], strides = [1, 1]} : vector<2x8xf32> to vector<2x1xf32>
      %62 = vector.extract_strided_slice %59 {offsets = [0, 2], sizes = [2, 1], strides = [1, 1]} : vector<2x8xf32> to vector<2x1xf32>
      %63 = vector.extract_strided_slice %59 {offsets = [0, 3], sizes = [2, 1], strides = [1, 1]} : vector<2x8xf32> to vector<2x1xf32>
      %64 = vector.extract_strided_slice %59 {offsets = [0, 4], sizes = [2, 1], strides = [1, 1]} : vector<2x8xf32> to vector<2x1xf32>
      %cst_22 = arith.constant 8.000000e+00 : f32
      %65 = vector.broadcast %cst_22 : f32 to vector<2x1xf32>
      %66 = arith.mulf %65, %63 : vector<2x1xf32>
      %67 = arith.mulf %60, %60 : vector<2x1xf32>
      %68 = arith.subf %66, %67 : vector<2x1xf32>
      %cst_23 = arith.constant 8.000000e+00 : f32
      %69 = vector.broadcast %cst_23 : f32 to vector<2x1xf32>
      %70 = arith.mulf %69, %64 : vector<2x1xf32>
      %71 = arith.mulf %61, %61 : vector<2x1xf32>
      %72 = arith.subf %70, %71 : vector<2x1xf32>
      %cst_24 = arith.constant 9.99999993E-9 : f32
      %cst_25 = arith.constant 9.99999993E-9 : f32
      %73 = arith.mulf %cst_24, %cst_25 : f32
      %cst_26 = arith.constant 8.000000e+00 : f32
      %74 = arith.mulf %73, %cst_26 : f32
      %cst_27 = arith.constant 8.000000e+00 : f32
      %cst_28 = arith.constant 1.000000e+00 : f32
      %75 = arith.subf %cst_27, %cst_28 : f32
      %76 = arith.mulf %74, %75 : f32
      %77 = vector.broadcast %76 : f32 to vector<2x1xf32>
      %78 = arith.cmpf ole, %68, %77 : vector<2x1xf32>
      %79 = vector.broadcast %76 : f32 to vector<2x1xf32>
      %80 = arith.cmpf ole, %72, %79 : vector<2x1xf32>
      %81 = arith.ori %78, %80 : vector<2x1xi1>
      %cst_29 = arith.constant 0.000000e+00 : f32
      %82 = vector.broadcast %cst_29 : f32 to vector<2x1xf32>
      %83 = arith.maximumf %68, %82 : vector<2x1xf32>
      %cst_30 = arith.constant 0.000000e+00 : f32
      %84 = vector.broadcast %cst_30 : f32 to vector<2x1xf32>
      %85 = arith.maximumf %72, %84 : vector<2x1xf32>
      %86 = arith.mulf %83, %85 : vector<2x1xf32>
      %87 = math.sqrt %86 : vector<2x1xf32>
      %cst_31 = arith.constant 9.99999993E-9 : f32
      %88 = vector.broadcast %cst_31 : f32 to vector<2x1xf32>
      %89 = arith.addf %87, %88 : vector<2x1xf32>
      %cst_32 = arith.constant 8.000000e+00 : f32
      %90 = vector.broadcast %cst_32 : f32 to vector<2x1xf32>
      %91 = arith.mulf %90, %62 : vector<2x1xf32>
      %92 = arith.mulf %60, %61 : vector<2x1xf32>
      %93 = arith.subf %91, %92 : vector<2x1xf32>
      %94 = arith.divf %93, %89 : vector<2x1xf32>
      %cst_33 = arith.constant 1.000000e+00 : f32
      %95 = vector.broadcast %cst_33 : f32 to vector<2x1xf32>
      %96 = arith.subf %95, %94 : vector<2x1xf32>
      %cst_34 = arith.constant 0.000000e+00 : f32
      %97 = vector.broadcast %cst_34 : f32 to vector<2x1xf32>
      %98 = arith.select %81, %97, %96 : vector<2x1xi1>, vector<2x1xf32>
      %c0_35 = arith.constant 0 : index
      %c0_36 = arith.constant 0 : index
      %99 = vector.load %arg4[%c0_35, %c0_36] : memref<2x1xf32, #tpu.memory_space<vmem>>, vector<2x1xf32>
      tpu.vector_store %arg4[%c0_35, %c0_36], %98 {strides = array<i32>} : memref<2x1xf32, #tpu.memory_space<vmem>>, vector<2x1xf32>,
    } else {
    }
    return
  }
  func.func @transform_0(%arg0: i32, %arg1: i32) -> (i32, i32) {
    %c0_i32 = arith.constant 0 : i32
    return %arg0, %arg1 : i32, i32
  }
  func.func @transform_1(%arg0: i32, %arg1: i32) -> (i32, i32) {
    %c0_i32 = arith.constant 0 : i32
    return %arg0, %arg1 : i32, i32
  }
  func.func @transform_2(%arg0: i32, %arg1: i32) -> (i32, i32) {
    %c0_i32 = arith.constant 0 : i32
    %c0_i32_0 = arith.constant 0 : i32
    return %arg0, %c0_i32 : i32, i32
  }
}

</mosaic_0001>

<bundles_post_ra>
// kernel: tpu_custom_call.1
= control target key start
LH: loop header
LB: loop body
LE: loop exit
PB: predicated region body
PF: predicated region fallthrough
CT: control target
= control target key end

     0   :  { %7 = vsyncpa [#allocation4], 0  ;;  %s169_s9 = smov [#allocation3]   ;;  %s219_s0 = inlined_call_operand.hbm [shape: f32[2,8], index: 0, kind: input, shape index: {}]   ;;  %s220_s1 = inlined_call_operand.vmem [shape: f32[2,8], index: 1, kind: input, shape index: {}]   ;;  %s221_s2 = inlined_call_operand.vmem [shape: f32[2,1], index: 2, kind: output, shape index: {}]  }
   0x1   :  { %s14_s10 = sshll.u32 %s169_s9, 4  ;;  %s145_s13 = scalar_lea.hbm %s219_s0, 32  ;;  %s15_s10 = int_to_ptr.vmem [resolvable:$true] %s14_s10 }
   0x2   :  { %p146_p0 = scmp.ne.s32.totalorder %s219_s0, %s145_s13  ;;  %p149_p1 = scmp.lt.u32.totalorder %s145_s13, %s219_s0 }
   0x4   :  { %p151_p2 = pnand %p149_p1, %p146_p0 }
   0x6   :  { %154 = shalt.err (!%p151_p2)
}
   0x7   :  { %s155_s18 = scalar_lea.vmem %s15_s10, 32  ;;  %p160_p4 = scmp.lt.s32.totalorder %s15_s10, %s15_s10 }
   0x8   :  { %p156_p3 = scmp.ne.s32.totalorder %s15_s10, %s155_s18  ;;  %p161_p5 = scmp.lt.s32.totalorder %s155_s18, %s155_s18 }
   0xa   :  { %p162_p6 = por %p161_p5, %p160_p4 }
   0xc   :  { %p163_p7 = pnand %p162_p6, %p156_p3 }
   0xe   :  { %166 = shalt.err (!%p163_p7)
}
   0xf   :  { %17 = dma.hbm_to_vmem [thread:$0]  %s219_s0, 32, %s15_s10, [#allocation4]  }
  0x10   :  { %167 = dma.done.wait [#allocation4], 32  }
  0x11   :  { %168 = vsyncadd [#allocation4], 4294967264  ;;  %vm27_vm0 = vcmask 58368   ;;  %v170_v0 = vmov 0.0   ;;  %v29_v1 = vld [vmem:[#allocation3] sm:$0x3]  ;;  %v50_v11 = vlaneseq }
  0x12   :  { %28 = vst.msk [vmem:[#allocation2] sm:$0x3] %vm27_vm0, %v170_v0  ;;  %v30_v2 = vld [vmem:[%s220_s1] sm:$0x3]  ;;  %v32_v3 = vsel %vm27_vm0, %v29_v1, 0.0  ;;  %v42_v5 = vmul.f32 %v29_v1, %v29_v1  ;;  %s171_s0 = smov 3  }
  0x13   :  { %v38_v4 = vmul.f32 %v30_v2, %v29_v1  ;;  %33 = vadd.xlane.f32.xlu0 %v32_v3  ;;  %v35_v7 = vsel %vm27_vm0, %v30_v2, 0.0  ;;  %v46_v8 = vmul.f32 %v30_v2, %v30_v2  ;;  %v51_v12 = vand.u32 127, %v50_v11  ;;  %s172_s1 = smov 127   ;;  %s174_s23 = smov 2  }
  0x14   :  { %v43_v9 = vsel %vm27_vm0, %v42_v5, 0.0  ;;  %v173_v35 = vmov 0   ;;  %s175_s24 = smov 1   ;;  %s176_s25 = smov 125   ;;  %vm126_vm11 = vcmask 1024  }
  0x15   :  { %v39_v6 = vsel %vm27_vm0, %v38_v4, 0.0  ;;  %v47_v10 = vsel %vm27_vm0, %v46_v8, 0.0  ;;  %vm52_vm1 = vcmp.eq.s32.totalorder %v51_v12, 0  ;;  %vm54_vm2 = vcmp.eq.s32.totalorder %v51_v12, 1 }
  0x16   :  { %40 = vadd.xlane.f32.xlu1 %v39_v6  ;;  %vm57_vm3 = vcmp.eq.s32.totalorder %v51_v12, 2  ;;  %vm60_vm4 = vcmp.eq.s32.totalorder %v51_v12, 3  ;;  %vm63_vm5 = vcmp.eq.s32.totalorder %v51_v12, 4 }
  0x17   :  { %36 = vadd.xlane.f32.xlu0 %v35_v7 }
  0x19   :  { %v66_v26 = vld [vmem:[#allocation2] sm:$0x3] }
  0x1a   :  { %44 = vadd.xlane.f32.xlu1 %v43_v9 }
  0x1b   :  { %48 = vadd.xlane.f32.xlu0 %v47_v10 }
  0xa0   :  { %v34_v13 = vpop.xlane.xlu0 %33 }
  0xa1   :  { %v53_v16 = vsel %vm52_vm1, %v34_v13, 0.0 }
  0xa3   :  { %v41_v14 = vpop.xlane.xlu1 %40 }
  0xa4   :  { %v37_v15 = vpop.xlane.xlu0 %36  ;;  %v58_v20 = vsel %vm57_vm3, %v41_v14, 0.0 }
  0xa5   :  { %v55_v17 = vsel %vm54_vm2, %v37_v15, 0.0 }
  0xa6   :  { %v56_v18 = vadd.f32 %v55_v17, %v53_v16 }
  0xa7   :  { %v45_v19 = vpop.xlane.xlu1 %44 }
  0xa8   :  { %v61_v21 = vsel %vm60_vm4, %v45_v19, 0.0  ;;  %v59_v22 = vadd.f32 %v58_v20, %v56_v18  ;;  %v49_v23 = vpop.xlane.xlu0 %48 }
  0xa9   :  { %v64_v24 = vsel %vm63_vm5, %v49_v23, 0.0 }
  0xaa   :  { %v62_v25 = vadd.f32 %v61_v21, %v59_v22 }
  0xac   :  { %v65_v27 = vadd.f32 %v64_v24, %v62_v25 }
  0xae   :  { %v67_v28 = vadd.f32 %v66_v26, %v65_v27 }
  0xb0   :  { %68 = vst.msk [vmem:[#allocation2] sm:$0x3] %vm27_vm0, %v67_v28 }
  0xb7   :  { %v72_v29 = vld [vmem:[#allocation2] sm:$0x3] }
  0xb8   :  { %v74_v30 = vmul.f32 %v72_v29, %v72_v29  ;;  %v73_v31 = vmul.f32 8.0, %v72_v29 }
  0xba   :  { %76 = vrot.lane.b32.xlu1 %v74_v30, %s171_s0 }
  0xbe   :  { %101 = vrot.lane.b32.xlu1 %v72_v29, %s172_s1 }
 0x12c   :  { %v77_v32 = vpop.permute.xlu1 %76 }
 0x12d   :  { %v79_v33 = vsub.f32 %v73_v31, %v77_v32 }
 0x12f   :  { %v86_v34 = vmax.f32 %v79_v33, 0.0  ;;  %vm80_vm6 = vcmp.le.f32.partialorder %v79_v33, 5.6e-15 }
 0x130   :  { %v81_v36 = vsel %vm80_vm6, 1, %v173_v35  ;;  %v102_v45 = vpop.permute.xlu1 %101 }
 0x131   :  { %88 = vrot.lane.b32.xlu0 %v86_v34, %s172_s1  ;;  %v104_v46 = vmul.f32 %v102_v45, %v72_v29 }
 0x135   :  { %82 = vrot.lane.b32.xlu0 %v81_v36, %s172_s1 }
 0x1a3   :  { %v89_v37 = vpop.permute.xlu0 %88 }
 0x1a4   :  { %v91_v38 = vmul.f32 %v89_v37, %v86_v34 }
 0x1a6   :  { %141 = vrsqrt.f32 %v91_v38  ;;  %vm94_vm7 = vcmp.eq.f32.partialorder %v91_v38, inf  ;;  %v97_v41 = vand.u32 2147483648, %v91_v38  ;;  %vm96_vm8 = vcmp.eq.f32.partialorder %v91_v38, 0.0 }
 0x1a7   :  { %v83_v53 = vpop.permute.xlu0 %82 }
 0x1a8   :  { %vm84_vm9 = vcmp.ne.s32.totalorder %v83_v53, 0 }
 0x1a9   :  { %vm85_vm10 = vmor %vm80_vm6, %vm84_vm9 }
 0x1b0   :  { %v142_v39 = vpop.eup %141 }
 0x1b1   :  { %v93_v40 = vmul.f32 %v142_v39, %v91_v38 }
 0x1b3   :  { %v95_v42 = vsel %vm94_vm7, %v91_v38, %v93_v40 }
 0x1b4   :  { %v98_v43 = vsel %vm96_vm8, %v97_v41, %v95_v42 }
 0x1b5   :  { %v99_v44 = vadd.f32 1e-08, %v98_v43 }
 0x1b7   :  { %111 = vrot.lane.b32.xlu1 %v99_v44, %s172_s1 }
 0x1bb   :  { %106 = vrot.lane.b32.xlu1 %v104_v46, %s174_s23 }
 0x229   :  { %v112_v47 = vpop.permute.xlu1 %111 }
 0x22a   :  { %143 = vrcp.f32 %v112_v47 }
 0x22d   :  { %v107_v48 = vpop.permute.xlu1 %106 }
 0x22e   :  { %v109_v49 = vsub.f32 %v73_v31, %v107_v48 }
 0x234   :  { %v144_v50 = vpop.eup %143 }
 0x235   :  { %v115_v51 = vmul.f32 %v144_v50, %v109_v49 }
 0x237   :  { %v116_v52 = vsub.f32 1.0, %v115_v51 }
 0x239   :  { %118 = vrot.lane.b32.xlu1 %v116_v52, %s175_s24 }
 0x2ab   :  { %v119_v54 = vpop.permute.xlu1 %118 }
 0x2ac   :  { %v121_v55 = vsel %vm85_vm10, 0.0, %v119_v54 }
 0x2ad   :  { %123 = vrot.lane.b32.xlu0 %v121_v55, %s176_s25 }
 0x31f   :  { %v124_v56 = vpop.permute.xlu0 %123 }
 0x320   :  { %127 = vst.msk [vmem:[%s221_s2] sm:$0x3] %vm126_vm11, %v124_v56 }
 0x321   :  { %132 = vsyncpa [#allocation4], 1 }

</bundles_post_ra>
